<compile_context>
chip_gen: v5e
topology: v5e:2x2
jax: 0.10.0
libtpu: 0.0.40
codegen_flags: <defaults>
</compile_context>

<pallas_src>
import jax
import jax.numpy as jnp
from jax.experimental import pallas as pl
from jax.experimental.pallas import tpu as pltpu


_LANE = 128      # channel padding granularity (lane width)
_TILE_H = 8      # output rows per band (even); real UNet sizes would tune this
_COL0 = 8        # first valid output column inside the padded-width band


def _round_up(x, m):
    return (x + m - 1) // m * m


# ---------------------------------------------------------------------------
# pltpu.roll shift convention is load-bearing for the conv; verify it once on
# the device (outside of any trace) and adapt if it ever differs.
# ---------------------------------------------------------------------------
_ROLL_FORWARD = None


def _roll_is_forward():
    """True iff pltpu.roll matches jnp.roll (elements move to higher indices)."""
    global _ROLL_FORWARD
    if _ROLL_FORWARD is None:
        def probe(x_ref, o_ref):
            o_ref[...] = pltpu.roll(x_ref[...], 1, 0)

        x = jnp.arange(8 * 128, dtype=jnp.float32).reshape(8, 128)
        y = pl.pallas_call(
            probe, out_shape=jax.ShapeDtypeStruct((8, 128), jnp.float32)
        )(x)
        _ROLL_FORWARD = bool(y[1, 0] == x[0, 0])
    return _ROLL_FORWARD


def _shift_down(v, s):
    """Rows of v shifted by `s` toward higher indices (== jnp.roll(v, s, 0))."""
    if s == 0:
        return v
    amt = s if _roll_is_forward() else (v.shape[0] - s)
    return pltpu.roll(v, amt, 0)


# ---------------------------------------------------------------------------
# Kernel: one (batch, row-band) tile of conv3x3 + folded BN + ReLU.
# ---------------------------------------------------------------------------
def _conv3x3_bn_relu_kernel(xa_ref, xb_ref, w_ref, b_ref, o_ref):
    """
    xa_ref: (1, TH, WP, CIN)  bf16  main rows of the zero-padded input band
    xb_ref: (1, 2,  WP, CIN)  bf16  2-row halo directly below the band
    w_ref : (3, 3*CIN, COUT)  bf16  w_ref[dx][dy*CIN + ci, co] = K[dy, dx, ci, co]
    b_ref : (1, COUT)         f32   folded BatchNorm bias
    o_ref : (1, TH, W, COUT)        one band of the output feature map
    """
    _, th, wp, cin = xa_ref.shape
    _, _, w_out, cout = o_ref.shape
    n_rows = th * wp

    # Flatten (rows, padded width) -> one spatial axis.  WP is a multiple of 16
    # so the reshape preserves the bf16 (16, 128) tiling (no relayout copy).
    a = xa_ref[0].reshape(n_rows, cin)
    b = xb_ref[0].reshape(2 * wp, cin)

    # Vertical taps dy = 0, 1, 2: tile-aligned row shifts of the flattened band,
    # concatenated on the lane axis -> one fat K = 3*CIN MXU operand.
    taps = [a]
    for dy in (1, 2):
        taps.append(jnp.concatenate([a[dy * wp:], b[: dy * wp]], axis=0))
    xcat = jnp.concatenate(taps, axis=-1)                        # (n_rows, 3*CIN)

    # Horizontal taps dx = 2, 1, 0: one matmul each; the (2 - dx)-column shift
    # is applied to the f32 result with an XLU roll (no relayout copies).
    acc = jnp.dot(xcat, w_ref[2], preferred_element_type=jnp.float32)
    acc = acc + _shift_down(
        jnp.dot(xcat, w_ref[1], preferred_element_type=jnp.float32), 1)
    acc = acc + _shift_down(
        jnp.dot(xcat, w_ref[0], preferred_element_type=jnp.float32), 2)

    acc = jnp.maximum(acc + b_ref[...], 0.0)                     # bias + ReLU (f32)

    out = acc.reshape(th, wp, cout)[:, _COL0:_COL0 + w_out, :]   # drop pad columns
    o_ref[...] = out.astype(o_ref.dtype).reshape(1, th, w_out, cout)


# ---------------------------------------------------------------------------
# Host-side wrappers.
# ---------------------------------------------------------------------------
def _conv_bn_relu(x_nhwc, w_cat, bias_row, cin_p, out_dtype):
    """Fused 3x3 conv (stride 1, pad 1) + folded BN + ReLU over an NHWC input."""
    n, h, w, c = x_nhwc.shape
    cout_p = w_cat.shape[-1]

    th = _TILE_H if h >= _TILE_H else h + (h % 2)   # even band height
    nb = pl.cdiv(h, th)                             # row-bands per image
    hc = nb * th                                    # computed output rows
    wp = _round_up(w + _COL0, 16)                   # padded width (tile aligned)

    # One pad: 1 halo row above, (hc - h + 1) below, zero columns left/right,
    # and channel padding up to a multiple of 128 lanes.
    xp = jnp.pad(
        x_nhwc.astype(jnp.bfloat16),
        ((0, 0), (1, hc - h + 1),
         (_COL0 - 1, wp - (_COL0 - 1) - w), (0, cin_p - c)),
    )

    hb = th // 2
    out = pl.pallas_call(
        _conv3x3_bn_relu_kernel,
        out_shape=jax.ShapeDtypeStruct((n, hc, w, cout_p), out_dtype),
        grid=(n, nb),
        in_specs=[
            # main band rows [j*th, (j+1)*th)
            pl.BlockSpec((1, th, wp, cin_p), lambda i, j: (i, j, 0, 0)),
            # 2-row halo [(j+1)*th, (j+1)*th + 2), indexed in 2-row blocks
            pl.BlockSpec((1, 2, wp, cin_p), lambda i, j: (i, (j + 1) * hb, 0, 0)),
            # packed weights + bias stay resident (constant index map)
            pl.BlockSpec((3, 3 * cin_p, cout_p), lambda i, j: (0, 0, 0)),
            pl.BlockSpec((1, cout_p), lambda i, j: (0, 0)),
        ],
        out_specs=pl.BlockSpec((1, th, w, cout_p), lambda i, j: (i, j, 0, 0)),
        compiler_params=pltpu.CompilerParams(
            dimension_semantics=("parallel", "parallel"),
            vmem_limit_bytes=32 * 1024 * 1024,
        ),
    )(xp, xp, w_cat, bias_row)

    return out if hc == h else out[:, :h]


def _fold_bn_pack(w_hwio, conv_bias, gamma, beta, mean, var, *, cin_p, cout_p,
                  eps=1e-5):
    """Fold eval-mode BatchNorm into the conv, pad channels, pack for the MXU."""
    scale = gamma / jnp.sqrt(var + eps)                      # (cout,)
    w = w_hwio * scale
    b = (conv_bias - mean) * scale + beta
    cin, cout = w_hwio.shape[2], w_hwio.shape[3]
    w = jnp.pad(w, ((0, 0), (0, 0), (0, cin_p - cin), (0, cout_p - cout)))
    w_cat = (jnp.transpose(w, (1, 0, 2, 3))                  # (dx, dy, ci, co)
             .reshape(3, 3 * cin_p, cout_p).astype(jnp.bfloat16))
    bias = jnp.pad(b, (0, cout_p - cout)).reshape(1, cout_p).astype(jnp.float32)
    return w_cat, bias


@jax.jit
def _double_conv_jit(x_nchw, params):
    _, cin, _, _ = x_nchw.shape
    cout = params["w1"].shape[-1]
    cin_p = _round_up(cin, _LANE)
    cout_p = _round_up(cout, _LANE)

    w1, b1 = _fold_bn_pack(params["w1"], params["b1"], *params["bn1"],
                           cin_p=cin_p, cout_p=cout_p)
    w2, b2 = _fold_bn_pack(params["w2"], params["b2"], *params["bn2"],
                           cin_p=cout_p, cout_p=cout_p)

    # NCHW -> NHWC once at the module boundary (kept only for the PyTorch
    # interface; an all-NHWC model would drop both transposes).
    x = jnp.transpose(x_nchw, (0, 2, 3, 1))

    y1 = _conv_bn_relu(x, w1, b1, cin_p, jnp.bfloat16)       # bf16 intermediate
    y2 = _conv_bn_relu(y1, w2, b2, cout_p, jnp.float32)

    y2 = y2[..., :cout]                                      # drop channel pad
    return jnp.transpose(y2, (0, 3, 1, 2))                   # NHWC -> NCHW


def double_conv_forward(x_nchw, params):
    """DoubleConv forward pass.  x: NCHW (PyTorch convention), float32."""
    _roll_is_forward()     # resolve the roll convention outside the trace
    return _double_conv_jit(x_nchw, params)


# ---------------------------------------------------------------------------
# Parameters + pure-JAX reference.
# ---------------------------------------------------------------------------
def init_double_conv_params(key, in_channels, out_channels, dtype=jnp.float32):
    """Deterministic synthetic parameters matching DoubleConv's shapes."""
    ks = jax.random.split(key, 8)

    def conv_init(kw, kb, cin, cout):
        fan_in = cin * 3 * 3
        bound = 1.0 / jnp.sqrt(fan_in)
        w = jax.random.uniform(kw, (3, 3, cin, cout), dtype, -bound, bound)  # HWIO
        b = jax.random.uniform(kb, (cout,), dtype, -bound, bound)
        return w, b

    w1, b1 = conv_init(ks[0], ks[1], in_channels, out_channels)
    w2, b2 = conv_init(ks[2], ks[3], out_channels, out_channels)

    def bn_init(kg, kb, c):
        gamma = 1.0 + 0.1 * jax.random.normal(kg, (c,), dtype)
        beta = 0.1 * jax.random.normal(kb, (c,), dtype)
        return gamma, beta, jnp.zeros((c,), dtype), jnp.ones((c,), dtype)

    return dict(w1=w1, b1=b1, bn1=bn_init(ks[4], ks[5], out_channels),
                w2=w2, b2=b2, bn2=bn_init(ks[6], ks[7], out_channels))


def _reference_forward(x_nchw, params):
    """Pure-JAX reference (lax.conv, f32) for correctness checking."""
    def block(x, w_hwio, conv_b, bn):
        w_oihw = jnp.transpose(w_hwio, (3, 2, 0, 1))
        y = jax.lax.conv_general_dilated(
            x, w_oihw, window_strides=(1, 1), padding=((1, 1), (1, 1)),
            dimension_numbers=("NCHW", "OIHW", "NCHW"),
        ) + conv_b[None, :, None, None]
        gamma, beta, mean, var = bn
        y = (y - mean[None, :, None, None]) / jnp.sqrt(var + 1e-5)[None, :, None, None]
        y = y * gamma[None, :, None, None] + beta[None, :, None, None]
        return jnp.maximum(y, 0.0)

    x = block(x_nchw, params["w1"], params["b1"], params["bn1"])
    return block(x, params["w2"], params["b2"], params["bn2"])


if __name__ == "__main__":
    key = jax.random.PRNGKey(0)
    k_x, k_p = jax.random.split(key)

    in_channels, out_channels = 4, 8
    x = jax.random.normal(k_x, (2, in_channels, 16, 16), jnp.float32)  # NCHW
    params = init_double_conv_params(k_p, in_channels, out_channels)

    y = jax.block_until_ready(double_conv_forward(x, params))
    y_ref = _reference_forward(x, params)

    assert y.shape == (2, out_channels, 16, 16)
    max_err = jnp.max(jnp.abs(y - y_ref))
    # bf16 MXU inputs with f32 accumulation -> loosened tolerance vs f32 reference.
    assert jnp.allclose(y, y_ref, atol=2e-2, rtol=2e-2), (
        f"mismatch vs reference (max abs err {max_err})")

    print("KERNEL_OK")
</pallas_src>

<mosaic_0001>
module attributes {stable_mosaic.version = 11 : i64} {
  func.func @probe(%arg0: memref<8x128xf32, #tpu.memory_space<vmem>>, %arg1: memref<8x128xf32, #tpu.memory_space<vmem>>) attributes {dimension_semantics = [], scalar_prefetch = 0 : i64, scratch_operands = 0 : i64, tpu.core_type = #tpu.core_type<tc>} {
    %c0 = arith.constant 0 : index
    %c0_0 = arith.constant 0 : index
    %0 = vector.load %arg0[%c0, %c0_0] : memref<8x128xf32, #tpu.memory_space<vmem>>, vector<8x128xf32>
    %c1_i32 = arith.constant 1 : i32
    %1 = tpu.dynamic_rotate %0 by %c1_i32 dim 0 : vector<8x128xf32>, i32 -> vector<8x128xf32>
    %c0_1 = arith.constant 0 : index
    %c0_2 = arith.constant 0 : index
    %2 = vector.load %arg1[%c0_1, %c0_2] : memref<8x128xf32, #tpu.memory_space<vmem>>, vector<8x128xf32>
    tpu.vector_store %arg1[%c0_1, %c0_2], %1 {strides = array<i32>} : memref<8x128xf32, #tpu.memory_space<vmem>>, vector<8x128xf32>,
    return
  }
}

</mosaic_0001>

<bundles_post_ra>
// kernel: tpu_custom_call.1
= control target key start
LH: loop header
LB: loop body
LE: loop exit
PB: predicated region body
PF: predicated region fallthrough
CT: control target
= control target key end

     0   :  { %6 = vsyncpa [#allocation3], 0  ;;  %s115_s0 = inlined_call_operand.hbm [shape: f32[8,128], index: 0, kind: input, shape index: {}]   ;;  %s116_s1 = inlined_call_operand.hbm [shape: f32[8,128], index: 1, kind: output, shape index: {}]  }
   0x1   :  { %7 = vsyncpa [#allocation4], 0  ;;  %s13_s8 = sshll.u32 %s115_s0, 4  ;;  %s97_s9 = smov [#allocation2]   ;;  %s14_s8 = int_to_ptr.hbm [resolvable:$true] %s13_s8 }
   0x2   :  { %s15_s10 = sshll.u32 %s97_s9, 4  ;;  %s16_s10 = int_to_ptr.vmem [resolvable:$true] %s15_s10 }
   0x3   :  { %18 = dma.hbm_to_vmem [thread:$0]  %s14_s8, 128, %s16_s10, [#allocation3]  }
   0x4   :  { %93 = dma.done.wait [#allocation3], 128  }
   0x5   :  { %94 = vsyncadd [#allocation3], 4294967168  ;;  %s98_s11 = smov [#allocation5]   ;;  %s33_s15 = sshll.u32 %s116_s1, 4  ;;  %v23_v0 = vld [vmem:[#allocation2] sm:$0xff]  ;;  %s34_s15 = int_to_ptr.hbm [resolvable:$true] %s33_s15 }
   0x6   :  { %s31_s12 = sshll.u32 %s98_s11, 4  ;;  %v24_v1 = vrot.slane %v23_v0, 7  ;;  %s32_s12 = int_to_ptr.vmem [resolvable:$true] %s31_s12 }
   0x8   :  { %25 = vst [vmem:[#allocation5] sm:$0xff] %v24_v1 }
   0x9   :  { %36 = dma.vmem_to_hbm [thread:$0]  %s32_s12, 128, %s34_s15, [#allocation4]  }
   0xa   :  { %95 = dma.done.wait [#allocation4], 128  }
   0xb   :  { %96 = vsyncadd [#allocation4], 4294967168 }
   0xc   :  { %41 = vsyncpa [#allocation3], 1 }
   0xd   :  { %42 = vsyncpa [#allocation4], 1 }

</bundles_post_ra>
